<compile_context>
chip_gen: v6e
topology: v6e:2x2x1
jax: 0.10.0
libtpu: 0.0.40
codegen_flags: <defaults>
</compile_context>

<pallas_src>
import functools
from typing import NamedTuple

import jax
import jax.numpy as jnp
from jax.experimental import pallas as pl
from jax.experimental.pallas import tpu as pltpu


def _round_up(x, m):
    return ((x + m - 1) // m) * m


# ---------------------------------------------------------------------------
# In-kernel exact GELU (erf via Abramowitz & Stegun 7.1.26, fp32).
# Uses only exp / mul / add / div / select, all Mosaic-supported.
# ---------------------------------------------------------------------------
def _erf_approx(z):
    a1, a2, a3, a4, a5 = (0.254829592, -0.284496736, 1.421413741,
                          -1.453152027, 1.061405429)
    p = 0.3275911
    sign = jnp.where(z >= 0.0, 1.0, -1.0)
    az = jnp.abs(z)
    t = 1.0 / (1.0 + p * az)
    poly = ((((a5 * t + a4) * t + a3) * t + a2) * t + a1) * t
    return sign * (1.0 - poly * jnp.exp(-az * az))


def _gelu_exact(x):
    return 0.5 * x * (1.0 + _erf_approx(x * 0.7071067811865476))


# ---------------------------------------------------------------------------
# Kernel body.  One (token-tile i, d_ff-tile kf) grid step.
#   x_ref:     (tm, D_pad)       input tile (block index constant across kf)
#   lnw_ref:   (1, D_pad)        layer-norm weight (fp32)
#   wgate_ref: (D_pad, 2*tf)     [wi_0 tile | wi_1 tile] fused, bf16
#   wo_ref:    (tf, D_pad)       wo row tile, bf16
#   o_ref:     (tm, D_pad)       output tile (revisited across kf)
#   y_ref:     (tm, D_pad)       bf16 scratch: cached normalized activations
#   acc_ref:   (tm, D_pad) fp32 scratch accumulator, or None (accumulate in o)
# ---------------------------------------------------------------------------
def _t5_ff_body(x_ref, lnw_ref, wgate_ref, wo_ref, o_ref, y_ref, acc_ref,
                *, eps, inv_d, tf):
    acc_into_out = acc_ref is None
    acc = o_ref if acc_into_out else acc_ref
    kf = pl.program_id(1)

    @pl.when(kf == 0)
    def _():
        x = x_ref[...].astype(jnp.float32)
        # T5LayerNorm: RMS over the *unpadded* d_model (inv_d = 1/d_model).
        var = jnp.sum(x * x, axis=-1, keepdims=True) * inv_d
        y = x * jax.lax.rsqrt(var + eps) * lnw_ref[...].astype(jnp.float32)
        y_ref[...] = y.astype(y_ref.dtype)              # bf16 LHS for the MXU
        if acc_into_out:
            acc[...] = x_ref[...].astype(acc.dtype)     # seed residual
        else:
            acc[...] = jnp.zeros_like(acc)

    # One fused MXU matmul for both gate projections: (tm, 2*tf), fp32 acc.
    h = jnp.dot(y_ref[...], wgate_ref[...], preferred_element_type=jnp.float32)
    h0 = h[:, :tf]                                       # wi_0 projection
    h1 = h[:, tf:]                                       # wi_1 projection
    gated = h0 * _gelu_exact(h1)                         # wi_0 * gelu(wi_1)

    part = jnp.dot(gated.astype(wo_ref.dtype), wo_ref[...],
                   preferred_element_type=jnp.float32)
    acc[...] = acc[...] + part.astype(acc.dtype)

    if not acc_into_out:
        @pl.when(kf == pl.num_programs(1) - 1)
        def _():
            o_ref[...] = (x_ref[...].astype(jnp.float32)
                          + acc[...]).astype(o_ref.dtype)


def _t5_ff_kernel_acc_in_out(x_ref, lnw_ref, wg_ref, wo_ref, o_ref, y_ref,
                             *, eps, inv_d, tf):
    _t5_ff_body(x_ref, lnw_ref, wg_ref, wo_ref, o_ref, y_ref, None,
                eps=eps, inv_d=inv_d, tf=tf)


def _t5_ff_kernel_acc_scratch(x_ref, lnw_ref, wg_ref, wo_ref, o_ref, y_ref,
                              acc_ref, *, eps, inv_d, tf):
    _t5_ff_body(x_ref, lnw_ref, wg_ref, wo_ref, o_ref, y_ref, acc_ref,
                eps=eps, inv_d=inv_d, tf=tf)


# ---------------------------------------------------------------------------
# Hoisted weight preparation (do once at init, reuse for every call).
# ---------------------------------------------------------------------------
class T5FFWeights(NamedTuple):
    lnw: jax.Array      # (1, D_pad) fp32
    wgate: jax.Array    # (D_pad, 2*F_pad) weight_dtype, per-tf-tile interleaved
    wo: jax.Array       # (F_pad, D_pad) weight_dtype
    d_model: int
    d_ff: int
    tf: int
    eps: float


def prepare_t5_ff_weights(ln_weight, wi0, wi1, wo, *, tf=256, eps=1e-6,
                          weight_dtype=jnp.bfloat16):
    D, F_ = wi0.shape
    D_pad = _round_up(D, 128)                                 # lane-dense
    tf = _round_up(max(128, min(tf, _round_up(F_, 128))), 128)
    F_pad = _round_up(F_, tf)
    nF = F_pad // tf

    wi0_p = wi0.astype(weight_dtype)
    wi1_p = wi1.astype(weight_dtype)
    if (D_pad, F_pad) != (D, F_):
        wi0_p = jnp.pad(wi0_p, ((0, D_pad - D), (0, F_pad - F_)))
        wi1_p = jnp.pad(wi1_p, ((0, D_pad - D), (0, F_pad - F_)))
    # Interleave per F-tile so column block kf = [wi_0 tile kf | wi_1 tile kf].
    wgate = jnp.stack([wi0_p.reshape(D_pad, nF, tf),
                       wi1_p.reshape(D_pad, nF, tf)], axis=2)
    wgate = wgate.reshape(D_pad, 2 * F_pad)

    wo_p = wo.astype(weight_dtype)
    if (F_pad, D_pad) != wo.shape:
        wo_p = jnp.pad(wo_p, ((0, F_pad - F_), (0, D_pad - D)))

    lnw2d = ln_weight.astype(jnp.float32).reshape(1, D)
    if D_pad != D:
        lnw2d = jnp.pad(lnw2d, ((0, 0), (0, D_pad - D)))

    return T5FFWeights(lnw=lnw2d, wgate=wgate, wo=wo_p,
                       d_model=D, d_ff=F_, tf=tf, eps=eps)


# ---------------------------------------------------------------------------
# VMEM budgeting helpers.
# ---------------------------------------------------------------------------
def _default_vmem_limit_bytes():
    kind = ""
    try:
        kind = jax.devices()[0].device_kind.lower()
    except Exception:
        pass
    # v5e / v6e: 128 MiB physical VMEM per core.  v7x (and unknown): 64 MiB.
    if "v5" in kind or "v6" in kind:
        return 100 * 1024 * 1024
    return 52 * 1024 * 1024


def _vmem_estimate_bytes(tm, tf, D_pad, x_itemsize, out_itemsize,
                         acc_into_out, w_itemsize):
    est = 2 * tm * D_pad * x_itemsize           # x tile, double-buffered
    est += 2 * tm * D_pad * out_itemsize        # out tile, double-buffered
    est += 2 * D_pad * (2 * tf) * w_itemsize    # fused wi tile
    est += 2 * tf * D_pad * w_itemsize          # wo tile
    est += tm * D_pad * 2                       # bf16 normalized-y scratch
    if not acc_into_out:
        est += tm * D_pad * 4                   # fp32 accumulator scratch
    return est


# ---------------------------------------------------------------------------
# Fused T5LayerFF forward.
# ---------------------------------------------------------------------------
def t5_layer_ff(hidden_states, weights: T5FFWeights, *, tm=512,
                vmem_limit_bytes=None, accumulate_in_output=None):
    """hidden_states: [B, S, D]; weights: output of prepare_t5_ff_weights."""
    B, S, D = hidden_states.shape
    assert D == weights.d_model, "d_model mismatch with prepared weights"
    D_pad = weights.lnw.shape[1]
    tf = weights.tf
    F_pad = weights.wo.shape[0]
    nF = F_pad // tf
    M = B * S
    out_dtype = hidden_states.dtype
    wdtype = weights.wgate.dtype

    if vmem_limit_bytes is None:
        vmem_limit_bytes = _default_vmem_limit_bytes()
    if accumulate_in_output is None:
        # Accumulating directly into the resident output block is only
        # numerically safe when the output dtype is fp32.
        accumulate_in_output = (out_dtype == jnp.float32)

    # Token tile: clip to problem size, keep sublane alignment, and back off
    # until the double-buffered pipeline footprint fits the VMEM budget.
    tm = _round_up(max(8, min(tm, _round_up(M, 8))), 8)
    x_isz = jnp.dtype(hidden_states.dtype).itemsize
    o_isz = jnp.dtype(out_dtype).itemsize
    w_isz = jnp.dtype(wdtype).itemsize
    while tm > 128 and _vmem_estimate_bytes(
            tm, tf, D_pad, x_isz, o_isz, accumulate_in_output,
            w_isz) > int(0.85 * vmem_limit_bytes):
        tm = max(128, tm - 128)

    M_pad = _round_up(M, tm)

    # Only materialize activation padding when actually required.
    x2d = hidden_states.reshape(M, D)
    if (M_pad, D_pad) != (M, D):
        x2d = jnp.pad(x2d, ((0, M_pad - M), (0, D_pad - D)))

    common = dict(eps=weights.eps, inv_d=1.0 / D, tf=tf)
    if accumulate_in_output:
        kernel = functools.partial(_t5_ff_kernel_acc_in_out, **common)
        scratch = [pltpu.VMEM((tm, D_pad), wdtype)]          # cached y
    else:
        kernel = functools.partial(_t5_ff_kernel_acc_scratch, **common)
        scratch = [pltpu.VMEM((tm, D_pad), wdtype),          # cached y
                   pltpu.VMEM((tm, D_pad), jnp.float32)]     # fp32 accumulator

    out2d = pl.pallas_call(
        kernel,
        out_shape=jax.ShapeDtypeStruct((M_pad, D_pad), out_dtype),
        grid_spec=pltpu.PrefetchScalarGridSpec(
            num_scalar_prefetch=0,
            grid=(M_pad // tm, nF),                  # (tokens, d_ff reduction)
            in_specs=[
                pl.BlockSpec((tm, D_pad), lambda i, kf: (i, 0)),       # x
                pl.BlockSpec((1, D_pad), lambda i, kf: (0, 0)),        # ln w
                pl.BlockSpec((D_pad, 2 * tf), lambda i, kf: (0, kf)),  # wi fused
                pl.BlockSpec((tf, D_pad), lambda i, kf: (kf, 0)),      # wo
            ],
            out_specs=pl.BlockSpec((tm, D_pad), lambda i, kf: (i, 0)),
            scratch_shapes=scratch,
        ),
        compiler_params=pltpu.CompilerParams(
            dimension_semantics=("parallel", "arbitrary"),
            vmem_limit_bytes=vmem_limit_bytes),
    )(x2d, weights.lnw, weights.wgate, weights.wo)

    return out2d[:M, :D].reshape(B, S, D)


# ---------------------------------------------------------------------------
# Pure-JAX reference (matches the PyTorch module exactly, fp32).
# ---------------------------------------------------------------------------
def _reference(hidden_states, ln_weight, wi0, wi1, wo, eps=1e-6):
    x = hidden_states.astype(jnp.float32)
    var = jnp.mean(x * x, axis=-1, keepdims=True)
    y = x * jax.lax.rsqrt(var + eps) * ln_weight.astype(jnp.float32)
    g = (y @ wi0) * jax.nn.gelu(y @ wi1, approximate=False)
    return (x + g @ wo).astype(hidden_states.dtype)


if __name__ == "__main__":
    # Small config consistent with the module: d_model=32, d_ff=64, seq=8, batch=2.
    B, S, D, Fdim = 2, 8, 32, 64
    key = jax.random.PRNGKey(0)
    k_x, k_ln, k_w0, k_w1, k_wo = jax.random.split(key, 5)

    x = jax.random.normal(k_x, (B, S, D), dtype=jnp.float32)
    ln_weight = jnp.ones((D,), dtype=jnp.float32) + 0.1 * jax.random.normal(
        k_ln, (D,), dtype=jnp.float32)
    wi0 = 0.05 * jax.random.normal(k_w0, (D, Fdim), dtype=jnp.float32)
    wi1 = 0.05 * jax.random.normal(k_w1, (D, Fdim), dtype=jnp.float32)
    wo = 0.05 * jax.random.normal(k_wo, (Fdim, D), dtype=jnp.float32)

    # Weight prep is hoisted: done once, reused for every call.
    weights = jax.block_until_ready(
        prepare_t5_ff_weights(ln_weight, wi0, wi1, wo, eps=1e-6))

    # Path 1: fp32 output -> accumulate directly into the output block.
    out = jax.block_until_ready(t5_layer_ff(x, weights))
    # Path 2: explicit fp32 scratch accumulator (used for non-fp32 outputs).
    out2 = jax.block_until_ready(
        t5_layer_ff(x, weights, accumulate_in_output=False))

    ref = _reference(x, ln_weight, wi0, wi1, wo, eps=1e-6)
    assert out.shape == (B, S, D)
    # bf16-fed MXU matmuls -> loosen tolerance vs the fp32 reference.
    assert jnp.allclose(out, ref, atol=3e-2, rtol=3e-2), "mismatch (acc-in-out)"
    assert jnp.allclose(out2, ref, atol=3e-2, rtol=3e-2), "mismatch (acc-scratch)"

    print("KERNEL_OK")
</pallas_src>

<mosaic_0001>
module attributes {stable_mosaic.version = 11 : i64} {
  func.func @_t5_ff_kernel_acc_in_out(%arg0: i32, %arg1: i32, %arg2: memref<16x128xf32, #tpu.memory_space<vmem>>, %arg3: memref<1x128xf32, #tpu.memory_space<vmem>>, %arg4: memref<128x256xbf16, #tpu.memory_space<vmem>>, %arg5: memref<128x128xbf16, #tpu.memory_space<vmem>>, %arg6: memref<16x128xf32, #tpu.memory_space<vmem>>, %arg7: memref<16x128xbf16, #tpu.memory_space<vmem>>) attributes {dimension_semantics = [#tpu.dimension_semantics<parallel>, #tpu.dimension_semantics<arbitrary>], iteration_bounds = array<i64: 1, 1>, scalar_prefetch = 0 : i64, scratch_operands = 1 : i64, tpu.core_type = #tpu.core_type<tc>, window_params = [{transform_indices = @transform_0, window_bounds = array<i64: 16, 128>}, {pipeline_mode = #tpu.pipeline_mode<synchronous>, transform_indices = @transform_1, window_bounds = array<i64: 1, 128>}, {transform_indices = @transform_2, window_bounds = array<i64: 128, 256>}, {transform_indices = @transform_3, window_bounds = array<i64: 128, 128>}, {transform_indices = @transform_4, window_bounds = array<i64: 16, 128>}]} {
    %c0_i32 = arith.constant 0 : i32
    %0 = arith.cmpi eq, %arg1, %c0_i32 : i32
    %1 = arith.extui %0 : i1 to i32
    %c0_i32_0 = arith.constant 0 : i32
    %2 = arith.cmpi ne, %1, %c0_i32_0 : i32
    scf.if %2 {
      %c0_27 = arith.constant 0 : index
      %c0_28 = arith.constant 0 : index
      %56 = vector.load %arg2[%c0_27, %c0_28] : memref<16x128xf32, #tpu.memory_space<vmem>>, vector<16x128xf32>
      %57 = arith.mulf %56, %56 : vector<16x128xf32>
      %cst_29 = arith.constant dense<0.000000e+00> : vector<16xf32>
      %58 = vector.multi_reduction <add>, %57, %cst_29 [1] : vector<16x128xf32> to vector<16xf32>
      %59 = vector.shape_cast %58 : vector<16xf32> to vector<16x1xf32>
      %cst_30 = arith.constant 3.125000e-02 : f32
      %60 = vector.broadcast %cst_30 : f32 to vector<16x1xf32>
      %61 = arith.mulf %59, %60 : vector<16x1xf32>
      %cst_31 = arith.constant 9.99999997E-7 : f32
      %62 = vector.broadcast %cst_31 : f32 to vector<16x1xf32>
      %63 = arith.addf %61, %62 : vector<16x1xf32>
      %64 = math.rsqrt %63 : vector<16x1xf32>
      %65 = vector.broadcast %64 : vector<16x1xf32> to vector<16x128xf32>
      %66 = arith.mulf %56, %65 : vector<16x128xf32>
      %c0_32 = arith.constant 0 : index
      %c0_33 = arith.constant 0 : index
      %67 = vector.load %arg3[%c0_32, %c0_33] : memref<1x128xf32, #tpu.memory_space<vmem>>, vector<1x128xf32>
      %68 = vector.broadcast %67 : vector<1x128xf32> to vector<16x128xf32>
      %69 = arith.mulf %66, %68 : vector<16x128xf32>
      %70 = arith.truncf %69 : vector<16x128xf32> to vector<16x128xbf16>
      %c0_34 = arith.constant 0 : index
      %c0_35 = arith.constant 0 : index
      %71 = vector.load %arg7[%c0_34, %c0_35] : memref<16x128xbf16, #tpu.memory_space<vmem>>, vector<16x128xbf16>
      tpu.vector_store %arg7[%c0_34, %c0_35], %70 {strides = array<i32>} : memref<16x128xbf16, #tpu.memory_space<vmem>>, vector<16x128xbf16>,
      %c0_36 = arith.constant 0 : index
      %c0_37 = arith.constant 0 : index
      %72 = vector.load %arg2[%c0_36, %c0_37] : memref<16x128xf32, #tpu.memory_space<vmem>>, vector<16x128xf32>
      %c0_38 = arith.constant 0 : index
      %c0_39 = arith.constant 0 : index
      %73 = vector.load %arg6[%c0_38, %c0_39] : memref<16x128xf32, #tpu.memory_space<vmem>>, vector<16x128xf32>
      tpu.vector_store %arg6[%c0_38, %c0_39], %72 {strides = array<i32>} : memref<16x128xf32, #tpu.memory_space<vmem>>, vector<16x128xf32>,
    } else {
    }
    %c0 = arith.constant 0 : index
    %c0_1 = arith.constant 0 : index
    %3 = vector.load %arg7[%c0, %c0_1] : memref<16x128xbf16, #tpu.memory_space<vmem>>, vector<16x128xbf16>
    %c0_2 = arith.constant 0 : index
    %c0_3 = arith.constant 0 : index
    %4 = vector.load %arg4[%c0_2, %c0_3] : memref<128x256xbf16, #tpu.memory_space<vmem>>, vector<128x256xbf16>
    %cst = arith.constant dense<0.000000e+00> : vector<16x256xf32>
    %5 = tpu.matmul %3, %4, %cst {dimension_numbers = #tpu.dot_dimension_numbers<[1], [0], [0], [1], [0, 0, 1, 1], [], []>} : vector<16x128xbf16>, vector<128x256xbf16>, vector<16x256xf32> -> vector<16x256xf32>
    %6 = vector.extract_strided_slice %5 {offsets = [0, 0], sizes = [16, 128], strides = [1, 1]} : vector<16x256xf32> to vector<16x128xf32>
    %7 = vector.extract_strided_slice %5 {offsets = [0, 128], sizes = [16, 128], strides = [1, 1]} : vector<16x256xf32> to vector<16x128xf32>
    %cst_4 = arith.constant 5.000000e-01 : f32
    %8 = vector.broadcast %cst_4 : f32 to vector<16x128xf32>
    %9 = arith.mulf %8, %7 : vector<16x128xf32>
    %cst_5 = arith.constant 0.707106769 : f32
    %10 = vector.broadcast %cst_5 : f32 to vector<16x128xf32>
    %11 = arith.mulf %7, %10 : vector<16x128xf32>
    %cst_6 = arith.constant 0.000000e+00 : f32
    %12 = vector.broadcast %cst_6 : f32 to vector<16x128xf32>
    %13 = arith.cmpf oge, %11, %12 : vector<16x128xf32>
    %cst_7 = arith.constant 1.000000e+00 : f32
    %cst_8 = arith.constant -1.000000e+00 : f32
    %14 = vector.broadcast %cst_7 : f32 to vector<16x128xf32>
    %15 = vector.broadcast %cst_8 : f32 to vector<16x128xf32>
    %16 = arith.select %13, %14, %15 : vector<16x128xi1>, vector<16x128xf32>
    %17 = math.absf %11 : vector<16x128xf32>
    %cst_9 = arith.constant 0.327591091 : f32
    %18 = vector.broadcast %cst_9 : f32 to vector<16x128xf32>
    %19 = arith.mulf %18, %17 : vector<16x128xf32>
    %cst_10 = arith.constant 1.000000e+00 : f32
    %20 = vector.broadcast %cst_10 : f32 to vector<16x128xf32>
    %21 = arith.addf %20, %19 : vector<16x128xf32>
    %cst_11 = arith.constant 1.000000e+00 : f32
    %22 = vector.broadcast %cst_11 : f32 to vector<16x128xf32>
    %23 = arith.divf %22, %21 : vector<16x128xf32>
    %cst_12 = arith.constant 1.06140542 : f32
    %24 = vector.broadcast %cst_12 : f32 to vector<16x128xf32>
    %25 = arith.mulf %24, %23 : vector<16x128xf32>
    %cst_13 = arith.constant -1.45315206 : f32
    %26 = vector.broadcast %cst_13 : f32 to vector<16x128xf32>
    %27 = arith.addf %25, %26 : vector<16x128xf32>
    %28 = arith.mulf %27, %23 : vector<16x128xf32>
    %cst_14 = arith.constant 1.42141378 : f32
    %29 = vector.broadcast %cst_14 : f32 to vector<16x128xf32>
    %30 = arith.addf %28, %29 : vector<16x128xf32>
    %31 = arith.mulf %30, %23 : vector<16x128xf32>
    %cst_15 = arith.constant -0.284496725 : f32
    %32 = vector.broadcast %cst_15 : f32 to vector<16x128xf32>
    %33 = arith.addf %31, %32 : vector<16x128xf32>
    %34 = arith.mulf %33, %23 : vector<16x128xf32>
    %cst_16 = arith.constant 0.254829586 : f32
    %35 = vector.broadcast %cst_16 : f32 to vector<16x128xf32>
    %36 = arith.addf %34, %35 : vector<16x128xf32>
    %37 = arith.mulf %36, %23 : vector<16x128xf32>
    %cst_17 = arith.constant 0.000000e+00 : f32
    %38 = vector.broadcast %cst_17 : f32 to vector<16x128xf32>
    %39 = arith.subf %38, %17 : vector<16x128xf32>
    %40 = arith.mulf %39, %17 : vector<16x128xf32>
    %41 = math.exp %40 : vector<16x128xf32>
    %42 = arith.mulf %37, %41 : vector<16x128xf32>
    %cst_18 = arith.constant 1.000000e+00 : f32
    %43 = vector.broadcast %cst_18 : f32 to vector<16x128xf32>
    %44 = arith.subf %43, %42 : vector<16x128xf32>
    %45 = arith.mulf %16, %44 : vector<16x128xf32>
    %cst_19 = arith.constant 1.000000e+00 : f32
    %46 = vector.broadcast %cst_19 : f32 to vector<16x128xf32>
    %47 = arith.addf %46, %45 : vector<16x128xf32>
    %48 = arith.mulf %9, %47 : vector<16x128xf32>
    %49 = arith.mulf %6, %48 : vector<16x128xf32>
    %50 = arith.truncf %49 : vector<16x128xf32> to vector<16x128xbf16>
    %c0_20 = arith.constant 0 : index
    %c0_21 = arith.constant 0 : index
    %51 = vector.load %arg5[%c0_20, %c0_21] : memref<128x128xbf16, #tpu.memory_space<vmem>>, vector<128x128xbf16>
    %cst_22 = arith.constant dense<0.000000e+00> : vector<16x128xf32>
    %52 = tpu.matmul %50, %51, %cst_22 {dimension_numbers = #tpu.dot_dimension_numbers<[1], [0], [0], [1], [0, 0, 1, 1], [], []>} : vector<16x128xbf16>, vector<128x128xbf16>, vector<16x128xf32> -> vector<16x128xf32>
    %c0_23 = arith.constant 0 : index
    %c0_24 = arith.constant 0 : index
    %53 = vector.load %arg6[%c0_23, %c0_24] : memref<16x128xf32, #tpu.memory_space<vmem>>, vector<16x128xf32>
    %54 = arith.addf %53, %52 : vector<16x128xf32>
    %c0_25 = arith.constant 0 : index
    %c0_26 = arith.constant 0 : index
    %55 = vector.load %arg6[%c0_25, %c0_26] : memref<16x128xf32, #tpu.memory_space<vmem>>, vector<16x128xf32>
    tpu.vector_store %arg6[%c0_25, %c0_26], %54 {strides = array<i32>} : memref<16x128xf32, #tpu.memory_space<vmem>>, vector<16x128xf32>,
    return
  }
  func.func @transform_0(%arg0: i32, %arg1: i32) -> (i32, i32) {
    %c0_i32 = arith.constant 0 : i32
    %c0_i32_0 = arith.constant 0 : i32
    return %arg0, %c0_i32 : i32, i32
  }
  func.func @transform_1(%arg0: i32, %arg1: i32) -> (i32, i32) {
    %c0_i32 = arith.constant 0 : i32
    %c0_i32_0 = arith.constant 0 : i32
    %c0_i32_1 = arith.constant 0 : i32
    return %c0_i32, %c0_i32_0 : i32, i32
  }
  func.func @transform_2(%arg0: i32, %arg1: i32) -> (i32, i32) {
    %c0_i32 = arith.constant 0 : i32
    %c0_i32_0 = arith.constant 0 : i32
    return %c0_i32, %arg1 : i32, i32
  }
  func.func @transform_3(%arg0: i32, %arg1: i32) -> (i32, i32) {
    %c0_i32 = arith.constant 0 : i32
    %c0_i32_0 = arith.constant 0 : i32
    return %arg1, %c0_i32 : i32, i32
  }
  func.func @transform_4(%arg0: i32, %arg1: i32) -> (i32, i32) {
    %c0_i32 = arith.constant 0 : i32
    %c0_i32_0 = arith.constant 0 : i32
    return %arg0, %c0_i32 : i32, i32
  }
}

</mosaic_0001>

<bundles_post_ra>
// kernel: tpu_custom_call.1
= control target key start
LH: loop header
LB: loop body
LE: loop exit
PB: predicated region body
PF: predicated region fallthrough
CT: control target
= control target key end

     0   :  { %9 = vsyncpa [#allocation4], 0  ;;  %s716_s0 = inlined_call_operand.hbm [shape: f32[16,128], index: 0, kind: input, shape index: {}]   ;;  %s717_s1 = inlined_call_operand.vmem [shape: f32[1,128], index: 1, kind: input, shape index: {}]   ;;  %s718_s2 = inlined_call_operand.hbm [shape: bf16[128,256], index: 2, kind: input, shape index: {}]   ;;  %s719_s3 = inlined_call_operand.hbm [shape: bf16[128,128], index: 3, kind: input, shape index: {}]   ;;  %s720_s4 = inlined_call_operand.hbm [shape: f32[16,128], index: 4, kind: output, shape index: {}]  }
   0x1   :  { %10 = vsyncpa [#allocation7], 0 }
   0x2   :  { %11 = vsyncpa [#allocation5], 0  ;;  %s643_s15 = smov [#allocation6]   ;;  %s644_s17 = smov [#allocation3]  }
   0x3   :  { %s31_s16 = sshll.u32 %s643_s15, 4  ;;  %s17_s18 = sshll.u32 %s644_s17, 4  ;;  %s32_s16 = int_to_ptr.vmem [resolvable:$true] %s31_s16  ;;  %s18_s18 = int_to_ptr.vmem [resolvable:$true] %s17_s18 }
   0x4   :  { %s565_s19 = scalar_lea.vmem %s32_s16, 2048  ;;  %p570_p1 = scmp.lt.s32.totalorder %s32_s16, %s32_s16 }
   0x5   :  { %p566_p0 = scmp.ne.s32.totalorder %s32_s16, %s565_s19  ;;  %p571_p2 = scmp.lt.s32.totalorder %s565_s19, %s565_s19 }
   0x7   :  { %p572_p3 = por %p571_p2, %p570_p1 }
   0x9   :  { %p573_p4 = pnand %p572_p3, %p566_p0 }
   0xb   :  { %576 = shalt.err (!%p573_p4)
}
   0xc   :  { %s645_s20 = smov 128   ;;  %s646_s21 = smov 8  }
   0xd   :  { %37 = dma.hbm_to_vmem [thread:$0]  %s718_s2, 2048, %s32_s16, [#allocation7], %s645_s20, %s645_s20, %s646_s21  }
   0xe   :  { %s585_s24 = scalar_lea.vmem %s18_s18, 256  ;;  %p590_p6 = scmp.lt.s32.totalorder %s18_s18, %s18_s18 }
   0xf   :  { %p586_p5 = scmp.ne.s32.totalorder %s18_s18, %s585_s24  ;;  %p591_p7 = scmp.lt.s32.totalorder %s585_s24, %s585_s24 }
  0x11   :  { %p592_p8 = por %p591_p7, %p590_p6 }
  0x13   :  { %p593_p9 = pnand %p592_p8, %p586_p5 }
  0x15   :  { %596 = shalt.err (!%p593_p9)
}
  0x16   :  { %23 = dma.hbm_to_vmem [thread:$0]  %s716_s0, 256, %s18_s18, [#allocation4], %s645_s20, %s645_s20, %s646_s21  }
  0x17   :  { %s647_s27 = smov [#allocation8]  }
  0x18   :  { %s43_s28 = sshll.u32 %s647_s27, 4  ;;  %s44_s28 = int_to_ptr.vmem [resolvable:$true] %s43_s28 }
  0x19   :  { %s605_s29 = scalar_lea.vmem %s44_s28, 1024  ;;  %p610_p11 = scmp.lt.s32.totalorder %s44_s28, %s44_s28 }
  0x1a   :  { %p606_p10 = scmp.ne.s32.totalorder %s44_s28, %s605_s29  ;;  %p611_p12 = scmp.lt.s32.totalorder %s605_s29, %s605_s29 }
  0x1c   :  { %p612_p13 = por %p611_p12, %p610_p11 }
  0x1e   :  { %p613_p0 = pnand %p612_p13, %p606_p10 }
  0x20   :  { %616 = shalt.err (!%p613_p0)
}
  0x21   :  { %s648_s2 = smov 64   ;;  %s649_s30 = smov 4  }
  0x22   :  { %49 = dma.hbm_to_vmem [thread:$0]  %s719_s3, 1024, %s44_s28, [#allocation7], %s648_s2, %s648_s2, %s649_s30  }
  0x23   :  { %637 = dma.done.wait [#allocation4], 256  }
  0x24   :  { %638 = vsyncadd [#allocation4], 4294967040 }
  0x25   :  { %639 = dma.done.wait [#allocation7], 3072  }
  0x26   :  { %640 = vsyncadd [#allocation7], 4294964224  ;;  %v695_v0 = vld [vmem:[#allocation3] sm:$0xff]  ;;  %v697_v1 = vld [vmem:[#allocation3 + $0x8] sm:$0xff]  ;;  %v650_v20 = vmov 0   ;;  %v651_v37 = vmov 0.0  }
  0x27   :  { %v66_v2 = vmul.f32 %v695_v0, %v695_v0  ;;  %v67_v3 = vmul.f32 %v697_v1, %v697_v1  ;;  %v512_v4 = vld [vmem:[#allocation6 + $0x74] ss:$8 sps:$4 sm:$0xff]   ;;  %v514_v5 = vld [vmem:[#allocation6 + $0x70] ss:$8 sps:$4 sm:$0xff]   ;;  %v515_v6 = vld [vmem:[#allocation6 + $0x64] ss:$8 sps:$4 sm:$0xff]   ;;  %239 = vmatprep.mubr.bf16.mxu0 %v650_v20  ;;  %480 = vmatprep.subr.bf16.mxu1 %v651_v37 }
  0x28   :  { %207 = vmatprep.subr.bf16.mxu0 %v512_v4  ;;  %v517_v7 = vld [vmem:[#allocation6 + $0x60] ss:$8 sps:$4 sm:$0xff]   ;;  %v518_v8 = vld [vmem:[#allocation6 + $0x54] ss:$8 sps:$4 sm:$0xff]   ;;  %v520_v9 = vld [vmem:[#allocation6 + $0x50] ss:$8 sps:$4 sm:$0xff]  }
  0x29   :  { %68 = vadd.xlane.f32.xlu0 %v66_v2  ;;  %208 = vmatpush1.bf16.msra.mxu0 %v514_v5  ;;  %v521_v10 = vld [vmem:[#allocation6 + $0x44] ss:$8 sps:$4 sm:$0xff]   ;;  %v523_v11 = vld [vmem:[#allocation6 + $0x40] ss:$8 sps:$4 sm:$0xff]   ;;  %v524_v12 = vld [vmem:[#allocation6 + $0x34] ss:$8 sps:$4 sm:$0xff]  }
  0x2a   :  { %209 = vmatprep.subr.bf16.mxu0 %v515_v6  ;;  %v526_v13 = vld [vmem:[#allocation6 + $0x30] ss:$8 sps:$4 sm:$0xff]   ;;  %v527_v14 = vld [vmem:[#allocation6 + $0x24] ss:$8 sps:$4 sm:$0xff]   ;;  %v529_v15 = vld [vmem:[#allocation6 + $0x20] ss:$8 sps:$4 sm:$0xff]  }
  0x2b   :  { %v530_v16 = vld [vmem:[#allocation6 + $0x14] ss:$8 sps:$4 sm:$0xff]   ;;  %v532_v17 = vld [vmem:[#allocation6 + $0x10] ss:$8 sps:$4 sm:$0xff]   ;;  %v533_v18 = vld [vmem:[#allocation6 + $0x4] ss:$8 sps:$4 sm:$0xff]  }
  0x2c   :  { %v535_v19 = vld [vmem:[#allocation6] ss:$8 sps:$4 sm:$0xff]   ;;  %v537_v36 = vld [vmem:[#allocation8 + $0x38] sm:$0xff]   ;;  %v538_v38 = vld [vmem:[#allocation8 + $0x30] sm:$0xff]   ;;  %vm652_vm0 = vmmov 0  }
  0x2d   :  { %70 = vadd.xlane.f32.xlu0 %v67_v3  ;;  %210 = vmatpush1.bf16.msra.mxu0 %v517_v7  ;;  %v436_v30 = vld [vmem:[%s717_s1] ss:$0 sm:$0xff]  ;;  %v540_v40 = vld [vmem:[#allocation8 + $0x20] sm:$0xff]   ;;  %v541_v41 = vld [vmem:[#allocation8 + $0x18] sm:$0xff]   ;;  %s654_s1 = smov [#allocation9]  }
  0x2e   :  { %211 = vmatprep.subr.bf16.mxu0 %v518_v8  ;;  %481 = vmatpush3.bf16.msra.mxu1 %v537_v36  ;;  %v539_v39 = vld [vmem:[#allocation8 + $0x28] sm:$0xff]   ;;  %v542_v42 = vld [vmem:[#allocation8 + $0x10] sm:$0xff]   ;;  %v544_v44 = vld [vmem:[#allocation8] sm:$0xff]   ;;  %s423_s7 = sshll.u32 %s654_s1, 4  ;;  %s424_s7 = int_to_ptr.vmem [resolvable:$true] %s423_s7 }
  0x2f   :  { %482 = vmatprep.subr.bf16.mxu1 %v651_v37  ;;  %v543_v43 = vld [vmem:[#allocation8 + $0x8] sm:$0xff]   ;;  %496 = vmatprep.mubr.msk.bf16.mxu1 %vm652_vm0, %v651_v37  ;;  %s617_s8 = scalar_lea.vmem %s424_s7, 256  ;;  %p622_p2 = scmp.lt.s32.totalorder %s424_s7, %s424_s7 }
  0x30   :  { %p618_p1 = scmp.ne.s32.totalorder %s424_s7, %s617_s8  ;;  %p623_p3 = scmp.lt.s32.totalorder %s617_s8, %s617_s8 }
  0x31   :  { %212 = vmatpush1.bf16.msra.mxu0 %v520_v9 }
  0x32   :  { %213 = vmatprep.subr.bf16.mxu0 %v521_v10  ;;  %483 = vmatpush3.bf16.msra.mxu1 %v538_v38  ;;  %p624_p4 = por %p623_p3, %p622_p2 }
  0x33   :  { %484 = vmatprep.subr.bf16.mxu1 %v651_v37 }
  0x34   :  { %p625_p5 = pnand %p624_p4, %p618_p1 }
  0x35   :  { %214 = vmatpush1.bf16.msra.mxu0 %v523_v11 }
  0x36   :  { %215 = vmatprep.subr.bf16.mxu0 %v524_v12  ;;  %485 = vmatpush3.bf16.msra.mxu1 %v539_v39 }
  0x37   :  { %486 = vmatprep.subr.bf16.mxu1 %v651_v37 }
  0x39   :  { %216 = vmatpush1.bf16.msra.mxu0 %v526_v13 }
  0x3a   :  { %217 = vmatprep.subr.bf16.mxu0 %v527_v14  ;;  %487 = vmatpush3.bf16.msra.mxu1 %v540_v40 }
  0x3b   :  { %488 = vmatprep.subr.bf16.mxu1 %v651_v37 }
  0x3d   :  { %218 = vmatpush1.bf16.msra.mxu0 %v529_v15 }
  0x3e   :  { %219 = vmatprep.subr.bf16.mxu0 %v530_v16  ;;  %489 = vmatpush3.bf16.msra.mxu1 %v541_v41 }
  0x3f   :  { %490 = vmatprep.subr.bf16.mxu1 %v651_v37 }
  0x41   :  { %220 = vmatpush1.bf16.msra.mxu0 %v532_v17 }
  0x42   :  { %221 = vmatprep.subr.bf16.mxu0 %v533_v18  ;;  %491 = vmatpush3.bf16.msra.mxu1 %v542_v42 }
  0x43   :  { %492 = vmatprep.subr.bf16.mxu1 %v651_v37 }
  0x45   :  { %222 = vmatpush1.bf16.msra.mxu0 %v535_v19 }
  0x46   :  { %493 = vmatpush3.bf16.msra.mxu1 %v543_v43 }
  0x47   :  { %494 = vmatprep.subr.bf16.mxu1 %v651_v37 }
  0x4a   :  { %495 = vmatpush3.bf16.msra.mxu1 %v544_v44 }
  0xb2   :  { %v69_v21 = vpop.xlane.xlu0 %68 }
  0xb3   :  { %v72_v22 = vmul.f32 0.03125, %v69_v21 }
  0xb5   :  { %v74_v23 = vadd.f32 1e-06, %v72_v22 }
  0xb6   :  { %v71_v24 = vpop.xlane.xlu0 %70 }
  0xb7   :  { %545 = vrsqrt.f32 %v74_v23  ;;  %v73_v25 = vmul.f32 0.03125, %v71_v24 }
  0xb9   :  { %v75_v26 = vadd.f32 1e-06, %v73_v25  ;;  %v653_v25 = vmov -1.0  }
  0xbb   :  { %547 = vrsqrt.f32 %v75_v26 }
  0xc4   :  { %v546_v27 = vpop.eup %545 }
  0xc5   :  { %v78_v28 = vmul.f32 %v546_v27, %v695_v0 }
  0xc7   :  { %v87_v32 = vmul.f32 %v436_v30, %v78_v28 }
  0xc8   :  { %v548_v29 = vpop.eup %547 }
  0xc9   :  { %v79_v31 = vmul.f32 %v548_v29, %v697_v1 }
  0xcb   :  { %v88_v33 = vmul.f32 %v436_v30, %v79_v31 }
  0xcd   :  { %v469_v34 = vpack.c.bf16 %v88_v33, %v87_v32 }
  0xcf   :  { %470 = vst [vmem:[#allocation2] sm:$0xff] %v469_v34  }
  0xd6   :  { %v536_v35 = vld [vmem:[#allocation2] sm:$0xff]  }
  0xd7   :  { %240 = vmatmul.mubr.bf16.vlgmr.msra.gmra.mxu0 %v536_v35 }
 0x197   :  { %v241_v45 = vpop.f32.mrf.mxu0 }
 0x199   :  { %v243_v46 = vpop.f32.mrf.mxu0 }
 0x19a   :  { %v252_v47 = vmul.f32 0.70710677, %v243_v46  ;;  %v250_v32 = vmul.f32 0.5, %v243_v46 }
 0x19b   :  { %v245_v48 = vpop.f32.mrf.mxu0 }
 0x19c   :  { %v258_v49 = vand.u32 2147483647, %v252_v47  ;;  %vm254_vm1 = vcmp.ge.f32.partialorder %v252_v47, 0.0 }
 0x19d   :  { %v247_v50 = vpop.f32.mrf.mxu0  ;;  %v256_v26 = vsel %vm254_vm1, 1.0, %v653_v25 }
 0x19e   :  { %v260_v51 = vmul.f32 0.3275911, %v258_v49  ;;  %v253_v52 = vmul.f32 0.70710677, %v247_v50  ;;  %v286_v57 = vsub.f32 0.0, %v258_v49  ;;  %v251_v35 = vmul.f32 0.5, %v247_v50 }
 0x1a0   :  { %v262_v53 = vadd.f32 1.0, %v260_v51  ;;  %v259_v54 = vand.u32 2147483647, %v253_v52  ;;  %v288_v58 = vmul.f32 %v286_v57, %v258_v49  ;;  %vm255_vm2 = vcmp.ge.f32.partialorder %v253_v52, 0.0 }
 0x1a1   :  { %v257_v31 = vsel %vm255_vm2, 1.0, %v653_v25 }
 0x1a2   :  { %549 = vrcp.f32 %v262_v53  ;;  %v261_v55 = vmul.f32 0.3275911, %v259_v54  ;;  %v287_v59 = vsub.f32 0.0, %v259_v54  ;;  %v290_v62 = vmul.f32 1.442695, %v288_v58 }
 0x1a4   :  { %v263_v56 = vadd.f32 1.0, %v261_v55  ;;  %v289_v63 = vmul.f32 %v287_v59, %v259_v54 }
 0x1a6   :  { %551 = vrcp.f32 %v263_v56  ;;  %v292_v6 = vmul.f32 1.442695, %v289_v63 }
 0x1a7   :  { %553 = vpow2.f32 %v290_v62 }
 0x1a8   :  { %555 = vpow2.f32 %v292_v6 }
 0x1af   :  { %v550_v60 = vpop.eup %549 }
 0x1b0   :  { %v268_v61 = vmul.f32 1.0614054, %v550_v60 }
 0x1b2   :  { %v270_v2 = vadd.f32 -1.4531521, %v268_v61 }
 0x1b3   :  { %v552_v3 = vpop.eup %551 }
 0x1b4   :  { %v272_v4 = vmul.f32 %v550_v60, %v270_v2  ;;  %v269_v5 = vmul.f32 1.0614054, %v552_v3  ;;  %v554_v19 = vpop.eup %553 }
 0x1b5   :  { %v556_v24 = vpop.eup %555 }
 0x1b6   :  { %v274_v7 = vadd.f32 1.4214138, %v272_v4  ;;  %v271_v8 = vadd.f32 -1.4531521, %v269_v5 }
 0x1b8   :  { %v276_v9 = vmul.f32 %v550_v60, %v274_v7  ;;  %v273_v10 = vmul.f32 %v552_v3, %v271_v8 }
 0x1ba   :  { %v278_v11 = vadd.f32 -0.28449672, %v276_v9  ;;  %v275_v12 = vadd.f32 1.4214138, %v273_v10 }
 0x1bc   :  { %v280_v13 = vmul.f32 %v550_v60, %v278_v11  ;;  %v277_v14 = vmul.f32 %v552_v3, %v275_v12 }
 0x1be   :  { %v282_v15 = vadd.f32 0.2548296, %v280_v13  ;;  %v279_v16 = vadd.f32 -0.28449672, %v277_v14 }
 0x1c0   :  { %v284_v17 = vmul.f32 %v550_v60, %v282_v15  ;;  %v281_v18 = vmul.f32 %v552_v3, %v279_v16 }
 0x1c2   :  { %v294_v20 = vmul.f32 %v554_v19, %v284_v17  ;;  %v283_v21 = vadd.f32 0.2548296, %v281_v18 }
 0x1c4   :  { %v296_v22 = vsub.f32 1.0, %v294_v20  ;;  %v285_v23 = vmul.f32 %v552_v3, %v283_v21 }
 0x1c6   :  { %v298_v27 = vmul.f32 %v296_v22, %v256_v26  ;;  %v295_v28 = vmul.f32 %v556_v24, %v285_v23 }
 0x1c8   :  { %v300_v29 = vadd.f32 1.0, %v298_v27  ;;  %v297_v30 = vsub.f32 1.0, %v295_v28 }
 0x1ca   :  { %v299_v33 = vmul.f32 %v297_v30, %v257_v31  ;;  %v302_v34 = vmul.f32 %v300_v29, %v250_v32 }
 0x1cc   :  { %v301_v36 = vadd.f32 1.0, %v299_v33  ;;  %v304_v38 = vmul.f32 %v302_v34, %v241_v45 }
 0x1ce   :  { %v303_v37 = vmul.f32 %v301_v36, %v251_v35 }
 0x1d0   :  { %v305_v39 = vmul.f32 %v303_v37, %v245_v48 }
 0x1d2   :  { %v306_v40 = vpack.c.bf16 %v305_v39, %v304_v38 }
 0x1d4   :  { %497 = vmatmul.mubr.bf16.vlgmr.msra.gmra.mxu1 %v306_v40 }
 0x294   :  { %v405_v41 = vpop.f32.mrf.mxu1 }
 0x295   :  { %v414_v42 = vadd.f32 %v405_v41, %v695_v0 }
 0x296   :  { %v498_v43 = vpop.f32.mrf.mxu1 }
 0x297   :  { %416 = vst [vmem:[#allocation9] sm:$0xff] %v414_v42 }
 0x298   :  { %v408_v44 = vpop.f32.mrf.mxu1 }
 0x299   :  { %v415_v47 = vadd.f32 %v408_v44, %v697_v1 }
 0x29a   :  { %v499_v46 = vpop.f32.mrf.mxu1 }
 0x29b   :  { %417 = vst [vmem:[#allocation9 + $0x8] sm:$0xff] %v415_v47 }
 0x29c   :  { %628 = shalt.err (!%p625_p5)
}
 0x29d   :  { %429 = dma.vmem_to_hbm [thread:$0]  %s424_s7, 256, %s720_s4, [#allocation5], %s645_s20, %s645_s20, %s646_s21  }
 0x29e   :  { %641 = dma.done.wait [#allocation5], 256  }
 0x29f   :  { %642 = vsyncadd [#allocation5], 4294967040 }
 0x2a0   :  { %433 = vsyncpa [#allocation4], 1 }
 0x2a1   :  { %434 = vsyncpa [#allocation7], 1 }
 0x2a2   :  { %435 = vsyncpa [#allocation5], 1 }

</bundles_post_ra>
